<compile_context>
chip_gen: v6e
topology: v6e:2x2x1
jax: 0.10.0
libtpu: 0.0.40
codegen_flags: <defaults>
</compile_context>

<pallas_src>
import functools

import jax
import jax.numpy as jnp
import numpy as np
from jax.experimental import pallas as pl
from jax.experimental.pallas import tpu as pltpu

EPS = 1e-5


# ---------------------------------------------------------------------------
# Small helpers
# ---------------------------------------------------------------------------
def _round_up(v, m):
    return (v + m - 1) // m * m


_VMEM_BUDGET = None


def _vmem_budget():
    """Usable VMEM budget in bytes (85% of physical; v7x-safe fallback)."""
    global _VMEM_BUDGET
    if _VMEM_BUDGET is None:
        try:
            cap = int(pltpu.get_tpu_info().vmem_capacity_bytes)
        except Exception:
            cap = 64 * 1024 * 1024  # v7x is the smallest generation (64 MiB / TC)
        _VMEM_BUDGET = int(cap * 0.85)
    return _VMEM_BUDGET


def _bn_relu_f32(h, gamma, beta, relu):
    """Train-mode BatchNorm (two-pass, biased variance) + optional ReLU. All f32."""
    mean = jnp.mean(h, axis=0, keepdims=True)          # (1, D)
    c = h - mean
    var = jnp.mean(c * c, axis=0, keepdims=True)       # two-pass: no cancellation
    scale = gamma * jax.lax.rsqrt(var + EPS)           # rsqrt rides the EUP slot
    y = c * scale + beta
    if relu:
        y = jnp.maximum(y, 0.0)
    return y


# ---------------------------------------------------------------------------
# Fused path: whole 3-layer MLP in ONE kernel (weights + activations VMEM-resident)
# ---------------------------------------------------------------------------
def _fused_mlp_kernel(x_ref, w1_ref, w2_ref, w3_ref,
                      g1_ref, be1_ref, g2_ref, be2_ref, g3_ref, be3_ref,
                      o_ref):
    # Layer 1: bf16 x bf16 -> f32 on the MXU, BN+ReLU in f32, recast bf16 for next MXU.
    h = jnp.dot(x_ref[...], w1_ref[...], preferred_element_type=jnp.float32)
    h = _bn_relu_f32(h, g1_ref[...], be1_ref[...], relu=True).astype(jnp.bfloat16)
    # Layer 2
    h = jnp.dot(h, w2_ref[...], preferred_element_type=jnp.float32)
    h = _bn_relu_f32(h, g2_ref[...], be2_ref[...], relu=True).astype(jnp.bfloat16)
    # Layer 3 (no ReLU)
    h = jnp.dot(h, w3_ref[...], preferred_element_type=jnp.float32)
    y = _bn_relu_f32(h, g3_ref[...], be3_ref[...], relu=False)
    o_ref[...] = y.astype(o_ref.dtype)


def _fused_footprint_bytes(n, k_pad, h_dim, d):
    weights = 2 * (k_pad * h_dim + h_dim * h_dim + h_dim * d)   # bf16 weights
    io = n * (2 * k_pad + 4 * d)                                # x (bf16 in), y (f32 out)
    temps = 2 * n * h_dim * (4 + 2) + n * d * 4                 # per-layer f32 + bf16 temps
    return weights + io + temps + (1 << 20)                     # + slack


def _fused_forward(xb, p):
    n = xb.shape[0]
    d = p["w3"].shape[1]
    return pl.pallas_call(
        _fused_mlp_kernel,
        out_shape=jax.ShapeDtypeStruct((n, d), jnp.float32),
        compiler_params=pltpu.CompilerParams(vmem_limit_bytes=_vmem_budget()),
    )(xb, p["w1"], p["w2"], p["w3"],
      p["g1"], p["be1"], p["g2"], p["be2"], p["g3"], p["be3"])


# ---------------------------------------------------------------------------
# Streamed path: one kernel per Linear+BN(+ReLU), weights streamed over a K grid axis
# ---------------------------------------------------------------------------
def _linear_bn_kernel(x_ref, w_ref, g_ref, be_ref, o_ref, acc_ref, *, relu):
    k = pl.program_id(1)

    @pl.when(k == 0)
    def _():
        acc_ref[...] = jnp.zeros_like(acc_ref)

    acc_ref[...] += jnp.dot(x_ref[...], w_ref[...],
                            preferred_element_type=jnp.float32)

    @pl.when(k == pl.num_programs(1) - 1)
    def _():
        y = _bn_relu_f32(acc_ref[...], g_ref[...], be_ref[...], relu)
        o_ref[...] = y.astype(o_ref.dtype)


def _tile_candidates(dim):
    """Tile sizes (desc) that divide `dim` and satisfy the (8,128) lane constraint."""
    cands = []
    t = dim
    while t >= 128:
        if dim % t == 0 and t % 128 == 0:
            cands.append(t)
        t //= 2
    if not cands:
        cands = [dim]  # block == full dim is always legal
    return sorted(set(cands), reverse=True)


def _select_tiles(n, k_dim, d, out_bytes, budget):
    """Largest (tn, tk) whose N-aware VMEM footprint fits the budget."""
    tn_cands = _tile_candidates(d)
    if d >= 256:
        # Prefer >= 2 feature tiles so the "parallel" axis can shard across v7x's 2 TCs.
        halved = [t for t in tn_cands if t <= d // 2]
        if halved:
            tn_cands = halved + [t for t in tn_cands if t > d // 2]
    tk_cands = _tile_candidates(k_dim)
    for tn in tn_cands:
        for tk in tk_cands:
            k_steps = k_dim // tk
            wbuf = 3 if k_steps >= 3 else 2            # weight-stream buffering depth
            need = (n * tn * 4                          # f32 accumulator (full batch)
                    + 2 * n * tk * 2                    # double-buffered activation blocks
                    + wbuf * tk * tn * 2                # streamed bf16 weight blocks
                    + 2 * n * tn * out_bytes            # double-buffered output blocks
                    + 4 * 8 * tn * 4                    # gamma/beta (sublane-padded)
                    + (1 << 20))                        # headroom
            if need <= budget:
                return tn, tk
    # TODO(synk): for batches so large that even 128-wide tiles overflow the budget,
    # add a batch-tile grid axis with partial sum/sumsq BN statistics (VMEM usage
    # then becomes independent of N).
    return tn_cands[-1], tk_cands[-1]


def linear_bn(x_bf16, w_bf16, gamma, beta, *, relu, out_dtype):
    """y = BN_train(x @ w) (+ ReLU).  x:[N,K] bf16, w:[K,D] bf16 (pre-cast/pre-padded)."""
    n, k_dim = x_bf16.shape
    k_dim2, d = w_bf16.shape
    assert k_dim == k_dim2
    budget = _vmem_budget()
    tn, tk = _select_tiles(n, k_dim, d, jnp.dtype(out_dtype).itemsize, budget)
    k_steps = k_dim // tk

    # Weight DMA is the binding resource in the thin-batch regime: buffer it deeper
    # when the K loop is long enough to benefit.
    if k_steps >= 3:
        w_spec = pl.BlockSpec((tk, tn), lambda j, k: (k, j),
                              pipeline_mode=pl.Buffered(3))
    else:
        w_spec = pl.BlockSpec((tk, tn), lambda j, k: (k, j))

    return pl.pallas_call(
        functools.partial(_linear_bn_kernel, relu=relu),
        out_shape=jax.ShapeDtypeStruct((n, d), out_dtype),
        grid_spec=pltpu.PrefetchScalarGridSpec(
            num_scalar_prefetch=0,
            grid=(d // tn, k_steps),                       # reduction (K) axis last
            in_specs=[
                pl.BlockSpec((n, tk), lambda j, k: (0, k)),    # activations (full batch)
                w_spec,                                        # weights, stored [in, out]
                pl.BlockSpec((1, tn), lambda j, k: (0, j)),    # BN gamma
                pl.BlockSpec((1, tn), lambda j, k: (0, j)),    # BN beta
            ],
            out_specs=pl.BlockSpec((n, tn), lambda j, k: (0, j)),
            scratch_shapes=[pltpu.VMEM((n, tn), jnp.float32)],
        ),
        compiler_params=pltpu.CompilerParams(
            dimension_semantics=("parallel", "arbitrary"),
            vmem_limit_bytes=budget),
    )(x_bf16, w_bf16, gamma, beta)


# ---------------------------------------------------------------------------
# Parameter preparation (done ONCE, outside the forward)
# ---------------------------------------------------------------------------
def prepare_params(params):
    """Pre-cast weights to bf16 and pre-pad the first contraction dim to 128 lanes."""
    in_dim = params["w1"].shape[0]
    k_pad = _round_up(in_dim, 128)
    w1 = params["w1"].astype(jnp.bfloat16)
    if k_pad != in_dim:
        w1 = jnp.pad(w1, ((0, k_pad - in_dim), (0, 0)))
    return dict(
        w1=w1,
        w2=params["w2"].astype(jnp.bfloat16),
        w3=params["w3"].astype(jnp.bfloat16),
        g1=params["g1"], be1=params["be1"],
        g2=params["g2"], be2=params["be2"],
        g3=params["g3"], be3=params["be3"],
    )


# ---------------------------------------------------------------------------
# Full projection MLP forward (train-mode BN, num_layers == 3)
# ---------------------------------------------------------------------------
def projection_mlp(x, prep, *, force_stream=False):
    """x: [N, in_dim] f32.  prep: output of prepare_params()."""
    n, in_dim = x.shape
    w1, w2, w3 = prep["w1"], prep["w2"], prep["w3"]
    k_pad = w1.shape[0]
    h_dim, d = w2.shape[0], w3.shape[1]

    xb = x.astype(jnp.bfloat16)
    if in_dim != k_pad:  # zero-pad contraction dim (exact; matches padded w1)
        xb = jnp.pad(xb, ((0, 0), (0, k_pad - in_dim)))

    budget = _vmem_budget()
    if (not force_stream
            and _fused_footprint_bytes(n, k_pad, h_dim, d) <= budget // 2):
        # Everything resident in VMEM: single launch, no intermediate HBM traffic.
        return _fused_forward(xb, prep)

    # TODO(synk): for 2048-wide layers an emit_pipeline-based fused kernel (weights
    # streamed over K inside ONE pallas_call) would also drop the intermediate HBM
    # round trips; the per-layer streamed kernels below are the simpler fallback.
    h = linear_bn(xb, w1, prep["g1"], prep["be1"], relu=True, out_dtype=jnp.bfloat16)
    h = linear_bn(h, w2, prep["g2"], prep["be2"], relu=True, out_dtype=jnp.bfloat16)
    return linear_bn(h, w3, prep["g3"], prep["be3"], relu=False, out_dtype=jnp.float32)


# ---------------------------------------------------------------------------
# Params + pure-JAX reference (keeps the biases, to show they are redundant)
# ---------------------------------------------------------------------------
def init_params(key, in_dim, hidden_dim, out_dim):
    assert out_dim == hidden_dim, "bn3 is BatchNorm1d(hidden_dim); need out_dim == hidden_dim"
    assert hidden_dim % 128 == 0 and out_dim % 128 == 0
    ks = jax.random.split(key, 9)

    def linear(kw, kb, fan_in, fan_out):
        bound = 1.0 / np.sqrt(fan_in)
        w = jax.random.uniform(kw, (fan_in, fan_out), jnp.float32, -bound, bound)
        b = jax.random.uniform(kb, (1, fan_out), jnp.float32, -bound, bound)
        return w, b

    w1, b1 = linear(ks[0], ks[1], in_dim, hidden_dim)
    w2, b2 = linear(ks[2], ks[3], hidden_dim, hidden_dim)
    w3, b3 = linear(ks[4], ks[5], hidden_dim, out_dim)

    g1 = 1.0 + 0.1 * jax.random.normal(ks[6], (1, hidden_dim), jnp.float32)
    g2 = 1.0 + 0.1 * jax.random.normal(ks[7], (1, hidden_dim), jnp.float32)
    g3 = 1.0 + 0.1 * jax.random.normal(ks[8], (1, out_dim), jnp.float32)
    be1 = jnp.zeros((1, hidden_dim), jnp.float32)
    be2 = jnp.zeros((1, hidden_dim), jnp.float32)
    be3 = jnp.zeros((1, out_dim), jnp.float32)

    return dict(w1=w1, b1=b1, g1=g1, be1=be1,
                w2=w2, b2=b2, g2=g2, be2=be2,
                w3=w3, b3=b3, g3=g3, be3=be3)


def _bn_train_ref(h, gamma, beta):
    mean = jnp.mean(h, axis=0, keepdims=True)
    var = jnp.mean((h - mean) * (h - mean), axis=0, keepdims=True)  # biased var
    return gamma * (h - mean) * jax.lax.rsqrt(var + EPS) + beta


def reference(x, p):
    """Pure-JAX reference of the PyTorch forward (WITH biases, same bf16 matmul path)."""
    def layer(h, w, b, g, be, relu):
        z = jnp.dot(h.astype(jnp.bfloat16), w.astype(jnp.bfloat16),
                    preferred_element_type=jnp.float32) + b
        y = _bn_train_ref(z, g, be)
        return jnp.maximum(y, 0.0) if relu else y

    h = layer(x, p["w1"], p["b1"], p["g1"], p["be1"], True)
    h = layer(h, p["w2"], p["b2"], p["g2"], p["be2"], True)
    return layer(h, p["w3"], p["b3"], p["g3"], p["be3"], False)


if __name__ == "__main__":
    # Small shapes consistent with the module: batch=8, in_dim=32, hidden=out=128.
    batch, in_dim, hidden_dim, out_dim = 8, 32, 128, 128

    key = jax.random.PRNGKey(0)
    kx, kp = jax.random.split(key)
    x = jax.random.normal(kx, (batch, in_dim), jnp.float32)
    params = init_params(kp, in_dim, hidden_dim, out_dim)
    prep = prepare_params(params)  # weights cast/padded ONCE, reused every forward

    y_ref = reference(x, params)

    # Fused single-kernel path (chosen automatically at this footprint).
    y_fused = jax.block_until_ready(projection_mlp(x, prep))
    np.testing.assert_allclose(np.asarray(y_fused), np.asarray(y_ref),
                               rtol=1e-2, atol=1e-2)

    # Streamed per-layer path (forced here to validate the large-shape fallback).
    y_stream = jax.block_until_ready(projection_mlp(x, prep, force_stream=True))
    np.testing.assert_allclose(np.asarray(y_stream), np.asarray(y_ref),
                               rtol=1e-2, atol=1e-2)

    # TODO(synk): nn.BatchNorm1d also updates running_mean/running_var buffers in train
    # mode; that side effect does not influence the forward output and is not modeled.
    # Eval-mode BN (running stats) is not implemented -- bias dropping is train-mode only.
    print("KERNEL_OK")
</pallas_src>

<mosaic_0001>
module attributes {stable_mosaic.version = 11 : i64} {
  func.func @_fused_mlp_kernel(%arg0: memref<8x128xbf16, #tpu.memory_space<vmem>>, %arg1: memref<128x128xbf16, #tpu.memory_space<vmem>>, %arg2: memref<128x128xbf16, #tpu.memory_space<vmem>>, %arg3: memref<128x128xbf16, #tpu.memory_space<vmem>>, %arg4: memref<1x128xf32, #tpu.memory_space<vmem>>, %arg5: memref<1x128xf32, #tpu.memory_space<vmem>>, %arg6: memref<1x128xf32, #tpu.memory_space<vmem>>, %arg7: memref<1x128xf32, #tpu.memory_space<vmem>>, %arg8: memref<1x128xf32, #tpu.memory_space<vmem>>, %arg9: memref<1x128xf32, #tpu.memory_space<vmem>>, %arg10: memref<8x128xf32, #tpu.memory_space<vmem>>) attributes {dimension_semantics = [], scalar_prefetch = 0 : i64, scratch_operands = 0 : i64, tpu.core_type = #tpu.core_type<tc>} {
    %c0 = arith.constant 0 : index
    %c0_0 = arith.constant 0 : index
    %0 = vector.load %arg0[%c0, %c0_0] : memref<8x128xbf16, #tpu.memory_space<vmem>>, vector<8x128xbf16>
    %c0_1 = arith.constant 0 : index
    %c0_2 = arith.constant 0 : index
    %1 = vector.load %arg1[%c0_1, %c0_2] : memref<128x128xbf16, #tpu.memory_space<vmem>>, vector<128x128xbf16>
    %cst = arith.constant dense<0.000000e+00> : vector<8x128xf32>
    %2 = tpu.matmul %0, %1, %cst {dimension_numbers = #tpu.dot_dimension_numbers<[1], [0], [0], [1], [0, 0, 1, 1], [], []>} : vector<8x128xbf16>, vector<128x128xbf16>, vector<8x128xf32> -> vector<8x128xf32>
    %c0_3 = arith.constant 0 : index
    %c0_4 = arith.constant 0 : index
    %3 = vector.load %arg4[%c0_3, %c0_4] : memref<1x128xf32, #tpu.memory_space<vmem>>, vector<1x128xf32>
    %c0_5 = arith.constant 0 : index
    %c0_6 = arith.constant 0 : index
    %4 = vector.load %arg5[%c0_5, %c0_6] : memref<1x128xf32, #tpu.memory_space<vmem>>, vector<1x128xf32>
    %cst_7 = arith.constant dense<0.000000e+00> : vector<128xf32>
    %5 = vector.multi_reduction <add>, %2, %cst_7 [0] : vector<8x128xf32> to vector<128xf32>
    %6 = vector.shape_cast %5 : vector<128xf32> to vector<1x128xf32>
    %cst_8 = arith.constant 8.000000e+00 : f32
    %7 = vector.broadcast %cst_8 : f32 to vector<1x128xf32>
    %8 = arith.divf %6, %7 : vector<1x128xf32>
    %9 = vector.broadcast %8 : vector<1x128xf32> to vector<8x128xf32>
    %10 = arith.subf %2, %9 : vector<8x128xf32>
    %11 = arith.mulf %10, %10 : vector<8x128xf32>
    %cst_9 = arith.constant dense<0.000000e+00> : vector<128xf32>
    %12 = vector.multi_reduction <add>, %11, %cst_9 [0] : vector<8x128xf32> to vector<128xf32>
    %13 = vector.shape_cast %12 : vector<128xf32> to vector<1x128xf32>
    %cst_10 = arith.constant 8.000000e+00 : f32
    %14 = vector.broadcast %cst_10 : f32 to vector<1x128xf32>
    %15 = arith.divf %13, %14 : vector<1x128xf32>
    %cst_11 = arith.constant 9.99999974E-6 : f32
    %16 = vector.broadcast %cst_11 : f32 to vector<1x128xf32>
    %17 = arith.addf %15, %16 : vector<1x128xf32>
    %18 = math.rsqrt %17 : vector<1x128xf32>
    %19 = arith.mulf %3, %18 : vector<1x128xf32>
    %20 = vector.broadcast %19 : vector<1x128xf32> to vector<8x128xf32>
    %21 = arith.mulf %10, %20 : vector<8x128xf32>
    %22 = vector.broadcast %4 : vector<1x128xf32> to vector<8x128xf32>
    %23 = arith.addf %21, %22 : vector<8x128xf32>
    %cst_12 = arith.constant 0.000000e+00 : f32
    %24 = vector.broadcast %cst_12 : f32 to vector<8x128xf32>
    %25 = arith.maximumf %23, %24 : vector<8x128xf32>
    %26 = arith.truncf %25 : vector<8x128xf32> to vector<8x128xbf16>
    %c0_13 = arith.constant 0 : index
    %c0_14 = arith.constant 0 : index
    %27 = vector.load %arg2[%c0_13, %c0_14] : memref<128x128xbf16, #tpu.memory_space<vmem>>, vector<128x128xbf16>
    %cst_15 = arith.constant dense<0.000000e+00> : vector<8x128xf32>
    %28 = tpu.matmul %26, %27, %cst_15 {dimension_numbers = #tpu.dot_dimension_numbers<[1], [0], [0], [1], [0, 0, 1, 1], [], []>} : vector<8x128xbf16>, vector<128x128xbf16>, vector<8x128xf32> -> vector<8x128xf32>
    %c0_16 = arith.constant 0 : index
    %c0_17 = arith.constant 0 : index
    %29 = vector.load %arg6[%c0_16, %c0_17] : memref<1x128xf32, #tpu.memory_space<vmem>>, vector<1x128xf32>
    %c0_18 = arith.constant 0 : index
    %c0_19 = arith.constant 0 : index
    %30 = vector.load %arg7[%c0_18, %c0_19] : memref<1x128xf32, #tpu.memory_space<vmem>>, vector<1x128xf32>
    %cst_20 = arith.constant dense<0.000000e+00> : vector<128xf32>
    %31 = vector.multi_reduction <add>, %28, %cst_20 [0] : vector<8x128xf32> to vector<128xf32>
    %32 = vector.shape_cast %31 : vector<128xf32> to vector<1x128xf32>
    %cst_21 = arith.constant 8.000000e+00 : f32
    %33 = vector.broadcast %cst_21 : f32 to vector<1x128xf32>
    %34 = arith.divf %32, %33 : vector<1x128xf32>
    %35 = vector.broadcast %34 : vector<1x128xf32> to vector<8x128xf32>
    %36 = arith.subf %28, %35 : vector<8x128xf32>
    %37 = arith.mulf %36, %36 : vector<8x128xf32>
    %cst_22 = arith.constant dense<0.000000e+00> : vector<128xf32>
    %38 = vector.multi_reduction <add>, %37, %cst_22 [0] : vector<8x128xf32> to vector<128xf32>
    %39 = vector.shape_cast %38 : vector<128xf32> to vector<1x128xf32>
    %cst_23 = arith.constant 8.000000e+00 : f32
    %40 = vector.broadcast %cst_23 : f32 to vector<1x128xf32>
    %41 = arith.divf %39, %40 : vector<1x128xf32>
    %cst_24 = arith.constant 9.99999974E-6 : f32
    %42 = vector.broadcast %cst_24 : f32 to vector<1x128xf32>
    %43 = arith.addf %41, %42 : vector<1x128xf32>
    %44 = math.rsqrt %43 : vector<1x128xf32>
    %45 = arith.mulf %29, %44 : vector<1x128xf32>
    %46 = vector.broadcast %45 : vector<1x128xf32> to vector<8x128xf32>
    %47 = arith.mulf %36, %46 : vector<8x128xf32>
    %48 = vector.broadcast %30 : vector<1x128xf32> to vector<8x128xf32>
    %49 = arith.addf %47, %48 : vector<8x128xf32>
    %cst_25 = arith.constant 0.000000e+00 : f32
    %50 = vector.broadcast %cst_25 : f32 to vector<8x128xf32>
    %51 = arith.maximumf %49, %50 : vector<8x128xf32>
    %52 = arith.truncf %51 : vector<8x128xf32> to vector<8x128xbf16>
    %c0_26 = arith.constant 0 : index
    %c0_27 = arith.constant 0 : index
    %53 = vector.load %arg3[%c0_26, %c0_27] : memref<128x128xbf16, #tpu.memory_space<vmem>>, vector<128x128xbf16>
    %cst_28 = arith.constant dense<0.000000e+00> : vector<8x128xf32>
    %54 = tpu.matmul %52, %53, %cst_28 {dimension_numbers = #tpu.dot_dimension_numbers<[1], [0], [0], [1], [0, 0, 1, 1], [], []>} : vector<8x128xbf16>, vector<128x128xbf16>, vector<8x128xf32> -> vector<8x128xf32>
    %c0_29 = arith.constant 0 : index
    %c0_30 = arith.constant 0 : index
    %55 = vector.load %arg8[%c0_29, %c0_30] : memref<1x128xf32, #tpu.memory_space<vmem>>, vector<1x128xf32>
    %c0_31 = arith.constant 0 : index
    %c0_32 = arith.constant 0 : index
    %56 = vector.load %arg9[%c0_31, %c0_32] : memref<1x128xf32, #tpu.memory_space<vmem>>, vector<1x128xf32>
    %cst_33 = arith.constant dense<0.000000e+00> : vector<128xf32>
    %57 = vector.multi_reduction <add>, %54, %cst_33 [0] : vector<8x128xf32> to vector<128xf32>
    %58 = vector.shape_cast %57 : vector<128xf32> to vector<1x128xf32>
    %cst_34 = arith.constant 8.000000e+00 : f32
    %59 = vector.broadcast %cst_34 : f32 to vector<1x128xf32>
    %60 = arith.divf %58, %59 : vector<1x128xf32>
    %61 = vector.broadcast %60 : vector<1x128xf32> to vector<8x128xf32>
    %62 = arith.subf %54, %61 : vector<8x128xf32>
    %63 = arith.mulf %62, %62 : vector<8x128xf32>
    %cst_35 = arith.constant dense<0.000000e+00> : vector<128xf32>
    %64 = vector.multi_reduction <add>, %63, %cst_35 [0] : vector<8x128xf32> to vector<128xf32>
    %65 = vector.shape_cast %64 : vector<128xf32> to vector<1x128xf32>
    %cst_36 = arith.constant 8.000000e+00 : f32
    %66 = vector.broadcast %cst_36 : f32 to vector<1x128xf32>
    %67 = arith.divf %65, %66 : vector<1x128xf32>
    %cst_37 = arith.constant 9.99999974E-6 : f32
    %68 = vector.broadcast %cst_37 : f32 to vector<1x128xf32>
    %69 = arith.addf %67, %68 : vector<1x128xf32>
    %70 = math.rsqrt %69 : vector<1x128xf32>
    %71 = arith.mulf %55, %70 : vector<1x128xf32>
    %72 = vector.broadcast %71 : vector<1x128xf32> to vector<8x128xf32>
    %73 = arith.mulf %62, %72 : vector<8x128xf32>
    %74 = vector.broadcast %56 : vector<1x128xf32> to vector<8x128xf32>
    %75 = arith.addf %73, %74 : vector<8x128xf32>
    %c0_38 = arith.constant 0 : index
    %c0_39 = arith.constant 0 : index
    %76 = vector.load %arg10[%c0_38, %c0_39] : memref<8x128xf32, #tpu.memory_space<vmem>>, vector<8x128xf32>
    tpu.vector_store %arg10[%c0_38, %c0_39], %75 {strides = array<i32>} : memref<8x128xf32, #tpu.memory_space<vmem>>, vector<8x128xf32>,
    return
  }
}

</mosaic_0001>

<bundles_post_ra>
// kernel: tpu_custom_call.1
= control target key start
LH: loop header
LB: loop body
LE: loop exit
PB: predicated region body
PF: predicated region fallthrough
CT: control target
= control target key end

     0   :  { %15 = vsyncpa [#allocation3], 0  ;;  %s933_s0 = inlined_call_operand.hbm [shape: bf16[8,128], index: 0, kind: input, shape index: {}]   ;;  %s934_s1 = inlined_call_operand.hbm [shape: bf16[128,128], index: 1, kind: input, shape index: {}]   ;;  %s935_s2 = inlined_call_operand.hbm [shape: bf16[128,128], index: 2, kind: input, shape index: {}]   ;;  %s936_s3 = inlined_call_operand.hbm [shape: bf16[128,128], index: 3, kind: input, shape index: {}]   ;;  %s937_s4 = inlined_call_operand.vmem [shape: f32[1,128], index: 4, kind: input, shape index: {}]   ;;  %s938_s5 = inlined_call_operand.vmem [shape: f32[1,128], index: 5, kind: input, shape index: {}]   ;;  %s939_s6 = inlined_call_operand.vmem [shape: f32[1,128], index: 6, kind: input, shape index: {}]   ;;  %s940_s7 = inlined_call_operand.vmem [shape: f32[1,128], index: 7, kind: input, shape index: {}]   ;;  %s941_s8 = inlined_call_operand.vmem [shape: f32[1,128], index: 8, kind: input, shape index: {}]   ;;  %s942_s9 = inlined_call_operand.vmem [shape: f32[1,128], index: 9, kind: input, shape index: {}]   ;;  %s943_s10 = inlined_call_operand.hbm [shape: f32[8,128], index: 10, kind: output, shape index: {}]  }
   0x1   :  { %16 = vsyncpa [#allocation6], 0 }
   0x2   :  { %17 = vsyncpa [#allocation9], 0 }
   0x3   :  { %18 = vsyncpa [#allocation4], 0  ;;  %s792_s13 = smov [#allocation5]  }
   0x4   :  { %s34_s14 = sshll.u32 %s792_s13, 4  ;;  %s35_s14 = int_to_ptr.vmem [resolvable:$true] %s34_s14 }
   0x5   :  { %s692_s15 = scalar_lea.vmem %s35_s14, 1024  ;;  %p697_p1 = scmp.lt.s32.totalorder %s35_s14, %s35_s14 }
   0x6   :  { %p693_p0 = scmp.ne.s32.totalorder %s35_s14, %s692_s15  ;;  %p698_p2 = scmp.lt.s32.totalorder %s692_s15, %s692_s15 }
   0x8   :  { %p699_p3 = por %p698_p2, %p697_p1 }
   0xa   :  { %p700_p4 = pnand %p699_p3, %p693_p0 }
   0xc   :  { %703 = shalt.err (!%p700_p4)
}
   0xd   :  { %s793_s16 = smov 64   ;;  %s794_s17 = smov 4  }
   0xe   :  { %40 = dma.hbm_to_vmem [thread:$0]  %s934_s1, 1024, %s35_s14, [#allocation6], %s793_s16, %s793_s16, %s794_s17  }
   0xf   :  { %s795_s20 = smov [#allocation2]   ;;  %s796_s22 = smov [#allocation7]  }
  0x10   :  { %s25_s21 = sshll.u32 %s795_s20, 4  ;;  %s46_s23 = sshll.u32 %s796_s22, 4  ;;  %s26_s21 = int_to_ptr.vmem [resolvable:$true] %s25_s21  ;;  %s47_s23 = int_to_ptr.vmem [resolvable:$true] %s46_s23 }
  0x11   :  { %s712_s24 = scalar_lea.vmem %s26_s21, 64  ;;  %p717_p6 = scmp.lt.s32.totalorder %s26_s21, %s26_s21 }
  0x12   :  { %p713_p5 = scmp.ne.s32.totalorder %s26_s21, %s712_s24  ;;  %p718_p7 = scmp.lt.s32.totalorder %s712_s24, %s712_s24 }
  0x14   :  { %p719_p8 = por %p718_p7, %p717_p6 }
  0x16   :  { %p720_p9 = pnand %p719_p8, %p713_p5 }
  0x18   :  { %723 = shalt.err (!%p720_p9)
}
  0x19   :  { %28 = dma.hbm_to_vmem [thread:$0]  %s933_s0, 64, %s26_s21, [#allocation3]  }
  0x1a   :  { %s732_s27 = scalar_lea.vmem %s47_s23, 1024  ;;  %p737_p11 = scmp.lt.s32.totalorder %s47_s23, %s47_s23 }
  0x1b   :  { %p733_p10 = scmp.ne.s32.totalorder %s47_s23, %s732_s27  ;;  %p738_p12 = scmp.lt.s32.totalorder %s732_s27, %s732_s27 }
  0x1d   :  { %p739_p13 = por %p738_p12, %p737_p11 }
  0x1f   :  { %p740_p0 = pnand %p739_p13, %p733_p10 }
  0x21   :  { %743 = shalt.err (!%p740_p0)
}
  0x22   :  { %52 = dma.hbm_to_vmem [thread:$0]  %s935_s2, 1024, %s47_s23, [#allocation6], %s793_s16, %s793_s16, %s794_s17  }
  0x23   :  { %s797_s29 = smov [#allocation8]  }
  0x24   :  { %s58_s30 = sshll.u32 %s797_s29, 4  ;;  %s59_s30 = int_to_ptr.vmem [resolvable:$true] %s58_s30 }
  0x25   :  { %s752_s11 = scalar_lea.vmem %s59_s30, 1024  ;;  %p757_p2 = scmp.lt.s32.totalorder %s59_s30, %s59_s30 }
  0x26   :  { %p753_p1 = scmp.ne.s32.totalorder %s59_s30, %s752_s11  ;;  %p758_p3 = scmp.lt.s32.totalorder %s752_s11, %s752_s11 }
  0x28   :  { %p759_p4 = por %p758_p3, %p757_p2 }
  0x2a   :  { %p760_p5 = pnand %p759_p4, %p753_p1 }
  0x2c   :  { %763 = shalt.err (!%p760_p5)
}
  0x2d   :  { %64 = dma.hbm_to_vmem [thread:$0]  %s936_s3, 1024, %s59_s30, [#allocation9], %s793_s16, %s793_s16, %s794_s17  }
  0x2e   :  { %784 = dma.done.wait [#allocation3], 64  }
  0x2f   :  { %785 = vsyncadd [#allocation3], 4294967232 }
  0x30   :  { %786 = dma.done.wait [#allocation6], 2048  }
  0x31   :  { %787 = vsyncadd [#allocation6], 4294965248 }
  0x32   :  { %788 = dma.done.wait [#allocation9], 1024  }
  0x33   :  { %789 = vsyncadd [#allocation9], 4294966272  ;;  %v798_v0 = vmov 0.0   ;;  %vm799_vm0 = vmmov 0   ;;  %v654_v1 = vld [vmem:[#allocation5 + $0x38] sm:$0xff]   ;;  %v655_v2 = vld [vmem:[#allocation5 + $0x30] sm:$0xff]   ;;  %v218_v39 = vlaneseq }
  0x34   :  { %585 = vmatprep.subr.bf16.mxu0 %v798_v0  ;;  %601 = vmatprep.mubr.msk.bf16.mxu0 %vm799_vm0, %v798_v0  ;;  %v656_v3 = vld [vmem:[#allocation5 + $0x28] sm:$0xff]   ;;  %v657_v4 = vld [vmem:[#allocation5 + $0x20] sm:$0xff]   ;;  %v658_v5 = vld [vmem:[#allocation5 + $0x18] sm:$0xff]   ;;  %s800_s19 = smov [#allocation10]  }
  0x35   :  { %605 = vmatprep.subr.bf16.mxu1 %v798_v0  ;;  %621 = vmatprep.mubr.msk.bf16.mxu1 %vm799_vm0, %v798_v0  ;;  %v659_v6 = vld [vmem:[#allocation5 + $0x10] sm:$0xff]   ;;  %v660_v7 = vld [vmem:[#allocation5 + $0x8] sm:$0xff]   ;;  %v661_v8 = vld [vmem:[#allocation5] sm:$0xff]   ;;  %v219_v40 = vshrl.u32 %v218_v39, 7  ;;  %s520_s20 = sshll.u32 %s800_s19, 4  ;;  %s521_s20 = int_to_ptr.vmem [resolvable:$true] %s520_s20 }
  0x36   :  { %586 = vmatpush3.bf16.msra.mxu0 %v654_v1  ;;  %v90_v9 = vld [vmem:[#allocation2] sm:$0xf]  ;;  %v663_v11 = vld [vmem:[#allocation7 + $0x30] sm:$0xff]   ;;  %v664_v12 = vld [vmem:[#allocation7 + $0x28] sm:$0xff]   ;;  %s764_s21 = scalar_lea.vmem %s521_s20, 128  ;;  %p769_p7 = scmp.lt.s32.totalorder %s521_s20, %s521_s20 }
  0x37   :  { %587 = vmatprep.subr.bf16.mxu0 %v798_v0  ;;  %v662_v10 = vld [vmem:[#allocation7 + $0x38] sm:$0xff]   ;;  %v665_v13 = vld [vmem:[#allocation7 + $0x20] sm:$0xff]   ;;  %v667_v15 = vld [vmem:[#allocation7 + $0x10] sm:$0xff]   ;;  %v903_v42 = vsub.s32 0, %v219_v40  ;;  %p765_p6 = scmp.ne.s32.totalorder %s521_s20, %s764_s21  ;;  %p770_p8 = scmp.lt.s32.totalorder %s764_s21, %s764_s21 }
  0x38   :  { %606 = vmatpush3.bf16.msra.mxu1 %v662_v10  ;;  %v666_v14 = vld [vmem:[#allocation7 + $0x18] sm:$0xff]   ;;  %v668_v16 = vld [vmem:[#allocation7 + $0x8] sm:$0xff]   ;;  %v669_v17 = vld [vmem:[#allocation7] sm:$0xff]  }
  0x39   :  { %607 = vmatprep.subr.bf16.mxu1 %v798_v0  ;;  %v195_v41 = vld [vmem:[%s937_s4] sm:$0x1]  ;;  %v671_v52 = vld [vmem:[#allocation8 + $0x30] sm:$0xff]   ;;  %v672_v53 = vld [vmem:[#allocation8 + $0x28] sm:$0xff]   ;;  %p771_p9 = por %p770_p8, %p769_p7 }
  0x3a   :  { %588 = vmatpush3.bf16.msra.mxu0 %v655_v2  ;;  %v539_v46 = vld [vmem:[%s938_s5] ss:$0 sm:$0xff]  ;;  %v673_v54 = vld [vmem:[#allocation8 + $0x20] sm:$0xff]   ;;  %v675_v56 = vld [vmem:[#allocation8 + $0x10] sm:$0xff]  }
  0x3b   :  { %589 = vmatprep.subr.bf16.mxu0 %v798_v0  ;;  %v670_v51 = vld [vmem:[#allocation8 + $0x38] sm:$0xff]   ;;  %v676_v57 = vld [vmem:[#allocation8 + $0x8] sm:$0xff]   ;;  %v677_v58 = vld [vmem:[#allocation8] sm:$0xff]   ;;  %p772_p10 = pnand %p771_p9, %p765_p6 }
  0x3c   :  { %608 = vmatpush3.bf16.msra.mxu1 %v663_v11  ;;  %v674_v55 = vld [vmem:[#allocation8 + $0x18] sm:$0xff]  }
  0x3d   :  { %609 = vmatprep.subr.bf16.mxu1 %v798_v0 }
  0x3e   :  { %590 = vmatpush3.bf16.msra.mxu0 %v656_v3 }
  0x3f   :  { %591 = vmatprep.subr.bf16.mxu0 %v798_v0 }
  0x40   :  { %610 = vmatpush3.bf16.msra.mxu1 %v664_v12 }
  0x41   :  { %611 = vmatprep.subr.bf16.mxu1 %v798_v0 }
  0x42   :  { %592 = vmatpush3.bf16.msra.mxu0 %v657_v4 }
  0x43   :  { %593 = vmatprep.subr.bf16.mxu0 %v798_v0 }
  0x44   :  { %612 = vmatpush3.bf16.msra.mxu1 %v665_v13 }
  0x45   :  { %613 = vmatprep.subr.bf16.mxu1 %v798_v0 }
  0x46   :  { %594 = vmatpush3.bf16.msra.mxu0 %v658_v5 }
  0x47   :  { %595 = vmatprep.subr.bf16.mxu0 %v798_v0 }
  0x48   :  { %614 = vmatpush3.bf16.msra.mxu1 %v666_v14 }
  0x49   :  { %615 = vmatprep.subr.bf16.mxu1 %v798_v0 }
  0x4a   :  { %596 = vmatpush3.bf16.msra.mxu0 %v659_v6 }
  0x4b   :  { %597 = vmatprep.subr.bf16.mxu0 %v798_v0 }
  0x4c   :  { %616 = vmatpush3.bf16.msra.mxu1 %v667_v15 }
  0x4d   :  { %617 = vmatprep.subr.bf16.mxu1 %v798_v0 }
  0x4e   :  { %598 = vmatpush3.bf16.msra.mxu0 %v660_v7 }
  0x4f   :  { %599 = vmatprep.subr.bf16.mxu0 %v798_v0 }
  0x50   :  { %618 = vmatpush3.bf16.msra.mxu1 %v668_v16  ;;  %v337_v16 = vld [vmem:[%s939_s6] sm:$0x1] }
  0x51   :  { %619 = vmatprep.subr.bf16.mxu1 %v798_v0 }
  0x52   :  { %600 = vmatpush3.bf16.msra.mxu0 %v661_v8 }
  0x53   :  { %625 = vmatprep.subr.bf16.mxu0 %v798_v0 }
  0x54   :  { %620 = vmatpush3.bf16.msra.mxu1 %v669_v17 }
  0x55   :  { %602 = vmatmul.mubr.bf16.vlgmr.msra.gmra.mxu0 %v90_v9 }
  0x56   :  { %641 = vmatprep.mubr.msk.bf16.mxu0 %vm799_vm0, %v798_v0  ;;  %626 = vmatpush3.bf16.msra.mxu0 %v670_v51  ;;  %v557_v51 = vld [vmem:[%s942_s9] ss:$0 sm:$0xff] }
  0x57   :  { %627 = vmatprep.subr.bf16.mxu0 %v798_v0 }
  0x5a   :  { %628 = vmatpush3.bf16.msra.mxu0 %v671_v52 }
  0x5b   :  { %629 = vmatprep.subr.bf16.mxu0 %v798_v0 }
  0x5e   :  { %630 = vmatpush3.bf16.msra.mxu0 %v672_v53 }
  0x5f   :  { %631 = vmatprep.subr.bf16.mxu0 %v798_v0 }
  0x62   :  { %632 = vmatpush3.bf16.msra.mxu0 %v673_v54 }
  0x63   :  { %633 = vmatprep.subr.bf16.mxu0 %v798_v0 }
  0x66   :  { %634 = vmatpush3.bf16.msra.mxu0 %v674_v55 }
  0x67   :  { %635 = vmatprep.subr.bf16.mxu0 %v798_v0 }
  0x6a   :  { %636 = vmatpush3.bf16.msra.mxu0 %v675_v56 }
  0x6b   :  { %637 = vmatprep.subr.bf16.mxu0 %v798_v0 }
  0x6e   :  { %638 = vmatpush3.bf16.msra.mxu0 %v676_v57 }
  0x6f   :  { %639 = vmatprep.subr.bf16.mxu0 %v798_v0 }
  0x72   :  { %640 = vmatpush3.bf16.msra.mxu0 %v677_v58 }
 0x115   :  { %v189_v18 = vpop.f32.mrf.mxu0 }
 0x116   :  { %v197_v19 = vrot.slane %v189_v18, 4 }
 0x117   :  { %v603_v20 = vpop.f32.mrf.mxu0 }
 0x118   :  { %v198_v21 = vadd.f32 %v197_v19, %v189_v18  ;;  %v548_v20 = vld [vmem:[%s940_s7] ss:$0 sm:$0xff] }
 0x119   :  { %v192_v22 = vpop.f32.mrf.mxu0 }
 0x11a   :  { %v199_v23 = vrot.slane %v198_v21, 2 }
 0x11b   :  { %v604_v24 = vpop.f32.mrf.mxu0 }
 0x11c   :  { %v200_v25 = vadd.f32 %v199_v23, %v198_v21 }
 0x11e   :  { %v201_v26 = vrot.slane %v200_v25, 1 }
 0x120   :  { %v202_v27 = vadd.f32 %v201_v26, %v200_v25 }
 0x122   :  { %v204_v28 = vmul.f32 0.125, %v202_v27 }
 0x124   :  { %v205_v29 = vsub.f32 %v189_v18, %v204_v28 }
 0x126   :  { %v206_v30 = vmul.f32 %v205_v29, %v205_v29 }
 0x128   :  { %v207_v31 = vrot.slane %v206_v30, 4 }
 0x12a   :  { %v208_v32 = vadd.f32 %v207_v31, %v206_v30 }
 0x12c   :  { %v209_v33 = vrot.slane %v208_v32, 2 }
 0x12e   :  { %v210_v34 = vadd.f32 %v209_v33, %v208_v32 }
 0x130   :  { %v211_v35 = vrot.slane %v210_v34, 1 }
 0x132   :  { %v212_v36 = vadd.f32 %v211_v35, %v210_v34 }
 0x134   :  { %v213_v37 = vmul.f32 0.125, %v212_v36 }
 0x136   :  { %v214_v38 = vadd.f32 1e-05, %v213_v37 }
 0x138   :  { %678 = vrsqrt.f32 %v214_v38 }
 0x145   :  { %v679_v43 = vpop.eup %678 }
 0x146   :  { %v216_v44 = vmul.f32 %v679_v43, %v195_v41 }
 0x148   :  { %v221_v45 = vrot.slane %v216_v44, %v903_v42 }
 0x14a   :  { %v223_v47 = vmul.f32 %v221_v45, %v205_v29 }
 0x14c   :  { %v230_v48 = vadd.f32 %v539_v46, %v223_v47  ;;  %v478_v47 = vld [vmem:[%s941_s8] sm:$0x1] }
 0x14e   :  { %v231_v49 = vmax.f32 %v230_v48, 0.0 }
 0x150   :  { %v232_v50 = vpack.c.bf16 %v231_v49, %v231_v49 }
 0x152   :  { %622 = vmatmul.mubr.bf16.vlgmr.msra.gmra.mxu1 %v232_v50 }
 0x212   :  { %v331_v59 = vpop.f32.mrf.mxu1 }
 0x213   :  { %v339_v60 = vrot.slane %v331_v59, 4 }
 0x214   :  { %v623_v61 = vpop.f32.mrf.mxu1 }
 0x215   :  { %v340_v62 = vadd.f32 %v339_v60, %v331_v59 }
 0x216   :  { %v334_v63 = vpop.f32.mrf.mxu1 }
 0x217   :  { %v341_v1 = vrot.slane %v340_v62, 2 }
 0x218   :  { %v624_v2 = vpop.f32.mrf.mxu1 }
 0x219   :  { %v342_v3 = vadd.f32 %v341_v1, %v340_v62 }
 0x21b   :  { %v343_v4 = vrot.slane %v342_v3, 1 }
 0x21d   :  { %v344_v5 = vadd.f32 %v343_v4, %v342_v3 }
 0x21f   :  { %v345_v6 = vmul.f32 0.125, %v344_v5 }
 0x221   :  { %v346_v7 = vsub.f32 %v331_v59, %v345_v6 }
 0x223   :  { %v347_v8 = vmul.f32 %v346_v7, %v346_v7 }
 0x225   :  { %v348_v9 = vrot.slane %v347_v8, 4 }
 0x227   :  { %v349_v10 = vadd.f32 %v348_v9, %v347_v8 }
 0x229   :  { %v350_v11 = vrot.slane %v349_v10, 2 }
 0x22b   :  { %v351_v12 = vadd.f32 %v350_v11, %v349_v10 }
 0x22d   :  { %v352_v0 = vrot.slane %v351_v12, 1 }
 0x22f   :  { %v353_v13 = vadd.f32 %v352_v0, %v351_v12 }
 0x231   :  { %v354_v14 = vmul.f32 0.125, %v353_v13 }
 0x233   :  { %v355_v15 = vadd.f32 1e-05, %v354_v14 }
 0x235   :  { %680 = vrsqrt.f32 %v355_v15 }
 0x242   :  { %v681_v17 = vpop.eup %680 }
 0x243   :  { %v357_v18 = vmul.f32 %v681_v17, %v337_v16 }
 0x245   :  { %v362_v19 = vrot.slane %v357_v18, %v903_v42 }
 0x247   :  { %v364_v21 = vmul.f32 %v362_v19, %v346_v7 }
 0x249   :  { %v371_v22 = vadd.f32 %v548_v20, %v364_v21 }
 0x24b   :  { %v372_v23 = vmax.f32 %v371_v22, 0.0 }
 0x24d   :  { %v373_v24 = vpack.c.bf16 %v372_v23, %v372_v23 }
 0x24f   :  { %642 = vmatmul.mubr.bf16.vlgmr.msra.gmra.mxu0 %v373_v24 }
 0x30f   :  { %v472_v25 = vpop.f32.mrf.mxu0 }
 0x310   :  { %v480_v26 = vrot.slane %v472_v25, 4 }
 0x311   :  { %v643_v27 = vpop.f32.mrf.mxu0 }
 0x312   :  { %v481_v28 = vadd.f32 %v480_v26, %v472_v25 }
 0x313   :  { %v475_v29 = vpop.f32.mrf.mxu0 }
 0x314   :  { %v482_v30 = vrot.slane %v481_v28, 2 }
 0x315   :  { %v644_v31 = vpop.f32.mrf.mxu0 }
 0x316   :  { %v483_v32 = vadd.f32 %v482_v30, %v481_v28 }
 0x318   :  { %v484_v33 = vrot.slane %v483_v32, 1 }
 0x31a   :  { %v485_v34 = vadd.f32 %v484_v33, %v483_v32 }
 0x31c   :  { %v486_v35 = vmul.f32 0.125, %v485_v34 }
 0x31e   :  { %v487_v36 = vsub.f32 %v472_v25, %v486_v35 }
 0x320   :  { %v488_v37 = vmul.f32 %v487_v36, %v487_v36 }
 0x322   :  { %v489_v38 = vrot.slane %v488_v37, 4 }
 0x324   :  { %v490_v39 = vadd.f32 %v489_v38, %v488_v37 }
 0x326   :  { %v491_v40 = vrot.slane %v490_v39, 2 }
 0x328   :  { %v492_v41 = vadd.f32 %v491_v40, %v490_v39 }
 0x32a   :  { %v493_v43 = vrot.slane %v492_v41, 1 }
 0x32c   :  { %v494_v44 = vadd.f32 %v493_v43, %v492_v41 }
 0x32e   :  { %v495_v45 = vmul.f32 0.125, %v494_v44 }
 0x330   :  { %v496_v46 = vadd.f32 1e-05, %v495_v45 }
 0x332   :  { %682 = vrsqrt.f32 %v496_v46 }
 0x33f   :  { %v683_v48 = vpop.eup %682 }
 0x340   :  { %v498_v49 = vmul.f32 %v683_v48, %v478_v47 }
 0x342   :  { %v503_v50 = vrot.slane %v498_v49, %v903_v42 }
 0x344   :  { %v505_v52 = vmul.f32 %v503_v50, %v487_v36 }
 0x346   :  { %v512_v53 = vadd.f32 %v557_v51, %v505_v52 }
 0x348   :  { %513 = vst [vmem:[#allocation10] sm:$0xff] %v512_v53 }
 0x349   :  { %775 = shalt.err (!%p772_p10)
}
 0x34a   :  { %523 = dma.vmem_to_hbm [thread:$0]  %s521_s20, 128, %s943_s10, [#allocation4]  }
 0x34b   :  { %790 = dma.done.wait [#allocation4], 128  }
 0x34c   :  { %791 = vsyncadd [#allocation4], 4294967168 }
 0x34d   :  { %527 = vsyncpa [#allocation3], 1 }
 0x34e   :  { %528 = vsyncpa [#allocation6], 1 }
 0x34f   :  { %529 = vsyncpa [#allocation9], 1 }
 0x350   :  { %530 = vsyncpa [#allocation4], 1 }

</bundles_post_ra>
